<compile_context>
chip_gen: v5e
topology: v5e:2x2
jax: 0.10.0
libtpu: 0.0.40
codegen_flags: <defaults>
</compile_context>

<pallas_src>
import functools

import jax
import jax.numpy as jnp
from jax.experimental import pallas as pl
from jax.experimental.pallas import tpu as pltpu

EXPANSION = 4
BN_EPS = 1e-5

# bf16 bytes of weights we are willing to keep resident in VMEM per matmul.
# Largest ResNet-101 bottleneck case (conv3 + shortcut of the last stage) is
# ~6.3 MiB, so all 1x1 convs take the weight-resident path.
_WEIGHT_RESIDENT_BUDGET = 12 * 1024 * 1024


def _vmem_limit_bytes():
    """Generation-aware scoped VMEM limit (v7x: 64 MiB phys, v5e/v6e: 128)."""
    try:
        cap = int(pltpu.get_tpu_info().vmem_capacity_bytes)
        return max(32 << 20, min((cap * 3) // 4, 96 << 20))
    except Exception:  # conservative default that is safe on v7x
        return 48 << 20


_VMEM_LIMIT = _vmem_limit_bytes()


def _round_up(x, m):
    return (x + m - 1) // m * m


def _pick_tile(dim, candidates):
    for c in candidates:
        if dim % c == 0:
            return c
    return dim


def _pick_tile_m(m):
    """Largest M tile (multiple of 8) dividing m, preferring >= 2 grid steps
    so both v7x TensorCores get parallel work."""
    cands = (512, 256, 128, 64, 32, 16, 8)
    for c in cands:
        if m % c == 0 and m // c >= 2:
            return c
    for c in cands:
        if m % c == 0:
            return c
    return m


# ----------------------------- Pallas kernels -----------------------------

def _mm_fused_kernel(*refs, relu, has_res, has_sc):
    """Weight-resident matmul: y = x @ w + b [+ xs @ ws + bs] [+ r], ReLU.

    Single grid axis over M; full weights live in VMEM, so there is no K
    accumulator and no init/finalize phase.
    """
    it = iter(refs)
    x_ref, w_ref, b_ref = next(it), next(it), next(it)
    acc = jnp.dot(x_ref[...], w_ref[...], preferred_element_type=jnp.float32)
    if has_sc:
        xs_ref, ws_ref, bs_ref = next(it), next(it), next(it)
        acc = acc + jnp.dot(xs_ref[...], ws_ref[...],
                            preferred_element_type=jnp.float32) + bs_ref[...]
    if has_res:
        r_ref = next(it)
        acc = acc + r_ref[...].astype(jnp.float32)
    acc = acc + b_ref[...]
    if relu:
        acc = jnp.maximum(acc, 0.0)
    o_ref = next(it)
    o_ref[...] = acc.astype(o_ref.dtype)


def _mm_kgrid_kernel(*refs, relu, has_res):
    """Fallback (M, N, K)-grid matmul step with a f32 VMEM accumulator."""
    x_ref, w_ref, b_ref = refs[0], refs[1], refs[2]
    r_ref = refs[3] if has_res else None
    o_ref = refs[3 + int(has_res)]
    acc_ref = refs[4 + int(has_res)]
    k = pl.program_id(2)

    @pl.when(k == 0)
    def _():
        acc_ref[...] = jnp.zeros_like(acc_ref)

    acc_ref[...] += jnp.dot(x_ref[...], w_ref[...],
                            preferred_element_type=jnp.float32)

    @pl.when(k == pl.num_programs(2) - 1)
    def _():
        y = acc_ref[...] + b_ref[...]
        if has_res:
            y = y + r_ref[...].astype(jnp.float32)
        if relu:
            y = jnp.maximum(y, 0.0)
        o_ref[...] = y.astype(o_ref.dtype)


def _conv3x3_kernel(x_ref, w_ref, b_ref, o_ref, xpad_ref, acc_ref,
                    *, h, w, ho, wo, stride):
    """3x3 conv + folded-BN bias + ReLU for one (batch, Cout-tile) grid step.

    x_ref:    (1, h, w, cin)   bf16 un-padded input block.
    w_ref:    (3, 3*cin, tn)   bf16 dw-packed weights (BN scale folded in).
    b_ref:    (1, tn)          f32 BN bias.
    o_ref:    (1, ho*wo, tn)   output block.
    xpad_ref: (h+2, w+2, cin)  bf16 VMEM scratch with the zero halo.
    acc_ref:  (ho*wo, tn)      f32 VMEM accumulator.
    """
    cin = x_ref.shape[-1]

    # Build the 1-pixel zero halo in VMEM once per batch element (removes the
    # HBM jnp.pad round trip).  The input block index does not depend on the
    # Cout-tile axis, so Pallas does not re-issue the DMA and the scratch stays
    # valid while j sweeps the Cout tiles.
    @pl.when(pl.program_id(1) == 0)
    def _():
        xpad_ref[...] = jnp.zeros_like(xpad_ref)
        xpad_ref[pl.ds(1, h), pl.ds(1, w), :] = x_ref[0]

    wspan = (wo - 1) * stride + 1
    for dh in range(3):                               # unrolled: static offsets
        if stride == 1:
            band = xpad_ref[pl.ds(dh, ho), :, :]      # (ho, w+2, cin)
        else:
            # TODO(synk): for stride=2 blocks, pre-deinterleaving even/odd
            # rows/cols in the wrapper would avoid these strided (XLU) slices.
            band = xpad_ref[pl.ds(dh, ho, stride=stride), :, :]
        taps = []
        for dw in range(3):
            if stride == 1:
                taps.append(band[:, dw:dw + wo, :])
            else:
                taps.append(band[:, dw:dw + wspan:stride, :])
        # Pack the 3 dw taps along K -> one K=3*cin matmul per dh (fills the
        # 256-deep MXU on v6e/v7x instead of three half-depth K=cin matmuls).
        xk = jnp.concatenate(taps, axis=-1).reshape(ho * wo, 3 * cin)
        part = jnp.dot(xk, w_ref[dh], preferred_element_type=jnp.float32)
        if dh == 0:
            acc_ref[...] = part
        else:
            acc_ref[...] += part

    y = jnp.maximum(acc_ref[...] + b_ref[...], 0.0)
    o_ref[...] = y[None].astype(o_ref.dtype)


# ----------------------------- kernel wrappers -----------------------------

def _matmul_fused(x, w, bias, *, relu, residual=None, shortcut=None,
                  out_dtype=jnp.float32):
    """y = x @ w + bias [+ xs @ ws + bs] [+ residual], optional ReLU.

    Shapes must be padded: M % 8 == 0, K % 128 == 0, N % 128 == 0.  Operands
    should be bf16; accumulation is f32.  Uses the weight-resident M-grid path
    whenever the (combined) weights fit the VMEM budget, otherwise falls back
    to an (M, N, K) grid with a f32 accumulator (splitting off the shortcut
    matmul in that case).
    """
    M, K = x.shape
    K2, N = w.shape
    assert K == K2 and bias.shape == (1, N)
    assert M % 8 == 0 and K % 128 == 0 and N % 128 == 0, (M, K, N)
    assert not (residual is not None and shortcut is not None)

    weight_bytes = K * N * w.dtype.itemsize
    if shortcut is not None:
        xs, ws, bs = shortcut
        assert xs.shape[0] == M and ws.shape == (xs.shape[1], N)
        assert xs.shape[1] % 128 == 0 and bs.shape == (1, N)
        weight_bytes += ws.size * ws.dtype.itemsize

    tm = _pick_tile_m(M)

    if weight_bytes <= _WEIGHT_RESIDENT_BUDGET:
        in_specs = [pl.BlockSpec((tm, K), lambda i: (i, 0)),
                    pl.BlockSpec((K, N), lambda i: (0, 0)),
                    pl.BlockSpec((1, N), lambda i: (0, 0))]
        args = [x, w, bias]
        if shortcut is not None:
            ks = xs.shape[1]
            in_specs += [pl.BlockSpec((tm, ks), lambda i: (i, 0)),
                         pl.BlockSpec((ks, N), lambda i: (0, 0)),
                         pl.BlockSpec((1, N), lambda i: (0, 0))]
            args += [xs, ws, bs]
        if residual is not None:
            assert residual.shape == (M, N)
            in_specs.append(pl.BlockSpec((tm, N), lambda i: (i, 0)))
            args.append(residual)
        kernel = functools.partial(_mm_fused_kernel, relu=relu,
                                   has_res=residual is not None,
                                   has_sc=shortcut is not None)
        return pl.pallas_call(
            kernel,
            out_shape=jax.ShapeDtypeStruct((M, N), out_dtype),
            grid=(M // tm,),
            in_specs=in_specs,
            out_specs=pl.BlockSpec((tm, N), lambda i: (i, 0)),
            compiler_params=pltpu.CompilerParams(
                dimension_semantics=("parallel",),
                vmem_limit_bytes=_VMEM_LIMIT),
        )(*args)

    # ---- fallback: weights too large to keep resident in VMEM ----
    if shortcut is not None:
        xs, ws, bs = shortcut
        res = _matmul_fused(xs, ws, bs, relu=False, out_dtype=jnp.bfloat16)
        return _matmul_fused(x, w, bias, relu=relu, residual=res,
                             out_dtype=out_dtype)

    tn = _pick_tile(N, (512, 256, 128))
    tk = _pick_tile(K, (512, 256, 128))
    grid = (M // tm, N // tn, K // tk)
    in_specs = [pl.BlockSpec((tm, tk), lambda i, j, k: (i, k)),
                pl.BlockSpec((tk, tn), lambda i, j, k: (k, j)),
                pl.BlockSpec((1, tn), lambda i, j, k: (0, j))]
    args = [x, w, bias]
    if residual is not None:
        assert residual.shape == (M, N)
        in_specs.append(pl.BlockSpec((tm, tn), lambda i, j, k: (i, j)))
        args.append(residual)
    kernel = functools.partial(_mm_kgrid_kernel, relu=relu,
                               has_res=residual is not None)
    return pl.pallas_call(
        kernel,
        out_shape=jax.ShapeDtypeStruct((M, N), out_dtype),
        grid=grid,
        in_specs=in_specs,
        out_specs=pl.BlockSpec((tm, tn), lambda i, j, k: (i, j)),
        scratch_shapes=[pltpu.VMEM((tm, tn), jnp.float32)],
        compiler_params=pltpu.CompilerParams(
            dimension_semantics=("parallel", "parallel", "arbitrary"),
            vmem_limit_bytes=_VMEM_LIMIT),
    )(*args)


def _conv3x3_bn_relu(x_nhwc, w_packed, bias, stride):
    """3x3 conv (padding=1, stride) + folded-BN bias + ReLU, no HBM im2col/pad.

    x_nhwc:   (N, H, W, Cin) bf16, Cin a multiple of 128.
    w_packed: (3, 3*Cin, Cout) bf16 dw-packed weights (BN scale folded in).
    bias:     (1, Cout) f32.
    Returns   (N, Ho*Wo, Cout) bf16.
    """
    n, h, w, cin = x_nhwc.shape
    cout = w_packed.shape[-1]
    assert w_packed.shape[1] == 3 * cin and cin % 128 == 0 and cout % 128 == 0
    ho = (h - 1) // stride + 1
    wo = (w - 1) // stride + 1
    tn = _pick_tile(cout, (512, 256, 128))
    kernel = functools.partial(_conv3x3_kernel, h=h, w=w, ho=ho, wo=wo,
                               stride=stride)
    # ResNet-101 conv2 shapes (<= 58x58x512 bf16 halo + <=1.6 MiB f32 acc) fit
    # comfortably in VMEM on all generations.
    # TODO(synk): spatially tile with a row halo for very large H*W, or for
    # batch == 1 on v7x so both TensorCores stay busy.
    return pl.pallas_call(
        kernel,
        out_shape=jax.ShapeDtypeStruct((n, ho * wo, cout), jnp.bfloat16),
        grid=(n, cout // tn),
        in_specs=[
            pl.BlockSpec((1, h, w, cin), lambda b, j: (b, 0, 0, 0)),
            pl.BlockSpec((3, 3 * cin, tn), lambda b, j: (0, 0, j)),
            pl.BlockSpec((1, tn), lambda b, j: (0, j)),
        ],
        out_specs=pl.BlockSpec((1, ho * wo, tn), lambda b, j: (b, 0, j)),
        scratch_shapes=[pltpu.VMEM((h + 2, w + 2, cin), jnp.bfloat16),
                        pltpu.VMEM((ho * wo, tn), jnp.float32)],
        compiler_params=pltpu.CompilerParams(
            # batch axis is parallel (megacore); the Cout axis stays
            # 'arbitrary' because the padded-input scratch is filled at j == 0
            # and reused across the Cout sweep for that batch element.
            dimension_semantics=("parallel", "arbitrary"),
            vmem_limit_bytes=_VMEM_LIMIT),
    )(x_nhwc, w_packed, bias)


# ----------------------------- JAX glue ------------------------------------

def _fold_bn(params, prefix, eps=BN_EPS):
    scale = (params[f"{prefix}_gamma"]
             / jnp.sqrt(params[f"{prefix}_var"] + eps)).astype(jnp.float32)
    bias = (params[f"{prefix}_beta"]
            - params[f"{prefix}_mean"] * scale).astype(jnp.float32)
    return scale, bias


def _pad2(a, rows, cols):
    r, c = a.shape
    return jnp.pad(a, ((0, rows - r), (0, cols - c)))


def _folded_1x1(params, wname, bnname, rows_p, cols_p):
    """1x1 conv weight as a padded (Cin_p, Cout_p) bf16 matrix with BN folded."""
    scale, bias = _fold_bn(params, bnname)
    wmat = jnp.transpose(params[wname][:, :, 0, 0], (1, 0)) * scale[None, :]
    wmat = _pad2(wmat, rows_p, cols_p).astype(jnp.bfloat16)
    bvec = _pad2(bias.reshape(1, -1), 1, cols_p)
    return wmat, bvec


def init_bottleneck_params(key, in_planes, planes, stride=1):
    out_planes = EXPANSION * planes
    keys = jax.random.split(key, 12)
    p = {
        "conv1_w": 0.1 * jax.random.normal(keys[0], (planes, in_planes, 1, 1), jnp.float32),
        "conv2_w": 0.1 * jax.random.normal(keys[1], (planes, planes, 3, 3), jnp.float32),
        "conv3_w": 0.1 * jax.random.normal(keys[2], (out_planes, planes, 1, 1), jnp.float32),
    }
    for i, (name, c) in enumerate([("bn1", planes), ("bn2", planes), ("bn3", out_planes)]):
        p[f"{name}_gamma"] = 1.0 + 0.05 * jax.random.normal(keys[3 + i], (c,), jnp.float32)
        p[f"{name}_beta"] = 0.05 * jax.random.normal(keys[6 + i], (c,), jnp.float32)
        p[f"{name}_mean"] = jnp.zeros((c,), jnp.float32)
        p[f"{name}_var"] = jnp.ones((c,), jnp.float32)
    if stride != 1 or in_planes != out_planes:
        p["sc_conv_w"] = 0.1 * jax.random.normal(keys[9], (out_planes, in_planes, 1, 1), jnp.float32)
        p["sc_bn_gamma"] = 1.0 + 0.05 * jax.random.normal(keys[10], (out_planes,), jnp.float32)
        p["sc_bn_beta"] = 0.05 * jax.random.normal(keys[11], (out_planes,), jnp.float32)
        p["sc_bn_mean"] = jnp.zeros((out_planes,), jnp.float32)
        p["sc_bn_var"] = jnp.ones((out_planes,), jnp.float32)
    # TODO(synk): SConv_2d / Interpolation_Coefficient(3) source was not provided;
    # modeled as a 3x3 conv whose weight is transformed by a 9x9 coefficient
    # matrix (identity placeholder here).
    p["coef3"] = jnp.eye(9, dtype=jnp.float32)
    return p


def bottleneck_forward(params, x_nchw, stride=1):
    """Inference-mode Bottleneck forward (BN folded into scale/bias)."""
    x = jnp.transpose(x_nchw, (0, 2, 3, 1)).astype(jnp.float32)   # NCHW -> NHWC
    n, h, w, cin = x.shape
    planes = params["conv1_w"].shape[0]
    out_planes = params["conv3_w"].shape[0]

    ho = (h - 1) // stride + 1
    wo = (w - 1) // stride + 1

    # Lane/tile-aligned (padded) sizes.
    cin_p = _round_up(cin, 128)
    pln_p = _round_up(planes, 128)
    out_p = _round_up(out_planes, 128)
    m1, m3 = n * h * w, n * ho * wo
    m1_p, m3_p = _round_up(m1, 8), _round_up(m3, 8)

    # Input as a padded bf16 (M, Cin) matrix.
    x_flat = jnp.pad(x.reshape(m1, cin), ((0, m1_p - m1), (0, cin_p - cin)))
    x_bf = x_flat.astype(jnp.bfloat16)

    # --- conv1 (1x1) + bn1 + relu :: weight-resident matmul ---
    w1, b1 = _folded_1x1(params, "conv1_w", "bn1", cin_p, pln_p)
    out1 = _matmul_fused(x_bf, w1, b1, relu=True, out_dtype=jnp.bfloat16)
    out1 = out1[:m1].reshape(n, h, w, pln_p)                       # bf16 NHWC

    # --- conv2: SConv_2d 3x3 (pad 1, conv_stride=stride) + bn2 + relu ---
    w2 = params["conv2_w"]
    co2, ci2 = w2.shape[0], w2.shape[1]
    w2 = (w2.reshape(co2 * ci2, 9) @ params["coef3"]).reshape(co2, ci2, 3, 3)
    s2, b2 = _fold_bn(params, "bn2")
    # dw-packed tap weights: (3, 3*Cin_p, Cout_p), row index = dw*Cin_p + cin.
    w2t = jnp.transpose(w2, (2, 3, 1, 0)) * s2[None, None, None, :]  # (3,3,ci,co)
    w2t = jnp.pad(w2t, ((0, 0), (0, 0), (0, pln_p - ci2), (0, pln_p - co2)))
    w2_packed = w2t.reshape(3, 3 * pln_p, pln_p).astype(jnp.bfloat16)
    b2p = _pad2(b2.reshape(1, -1), 1, pln_p)
    out2 = _conv3x3_bn_relu(out1, w2_packed, b2p, stride)          # (n, ho*wo, pln_p)
    out2 = out2.reshape(m3, pln_p)
    if m3_p != m3:
        out2 = jnp.pad(out2, ((0, m3_p - m3), (0, 0)))

    # --- conv3 (1x1) + bn3 + shortcut + residual add + relu: ONE kernel ---
    w3, b3 = _folded_1x1(params, "conv3_w", "bn3", pln_p, out_p)
    if "sc_conv_w" in params:
        x_sc = x[:, ::stride, ::stride, :].reshape(m3, cin)
        x_sc = jnp.pad(x_sc, ((0, m3_p - m3), (0, cin_p - cin))).astype(jnp.bfloat16)
        wsc, bsc = _folded_1x1(params, "sc_conv_w", "sc_bn", cin_p, out_p)
        out = _matmul_fused(out2, w3, b3, relu=True,
                            shortcut=(x_sc, wsc, bsc), out_dtype=jnp.float32)
    else:
        # identity shortcut: stride == 1 and cin == out_planes, shapes match.
        out = _matmul_fused(out2, w3, b3, relu=True, residual=x_bf,
                            out_dtype=jnp.float32)

    out = out[:m3, :out_planes].reshape(n, ho, wo, out_planes)
    return jnp.transpose(out, (0, 3, 1, 2))                        # NHWC -> NCHW


# ----------------------------- reference (pure JAX) -------------------------

def _reference_forward(params, x_nchw, stride=1):
    x = jnp.transpose(x_nchw, (0, 2, 3, 1)).astype(jnp.float32)

    def bn(y, pre):
        s = params[f"{pre}_gamma"] / jnp.sqrt(params[f"{pre}_var"] + BN_EPS)
        return (y - params[f"{pre}_mean"]) * s + params[f"{pre}_beta"]

    def conv(y, w_oihw, s, pad):
        return jax.lax.conv_general_dilated(
            y, jnp.transpose(w_oihw, (2, 3, 1, 0)),
            window_strides=(s, s), padding=pad,
            dimension_numbers=("NHWC", "HWIO", "NHWC"))

    out = jax.nn.relu(bn(conv(x, params["conv1_w"], 1, "VALID"), "bn1"))
    w2 = params["conv2_w"]
    co, ci = w2.shape[0], w2.shape[1]
    w2 = (w2.reshape(co * ci, 9) @ params["coef3"]).reshape(co, ci, 3, 3)
    out = jax.nn.relu(bn(conv(out, w2, stride, [(1, 1), (1, 1)]), "bn2"))
    out = bn(conv(out, params["conv3_w"], 1, "VALID"), "bn3")
    if "sc_conv_w" in params:
        sc = bn(conv(x, params["sc_conv_w"], stride, "VALID"), "sc_bn")
    else:
        sc = x
    out = jax.nn.relu(out + sc)
    return jnp.transpose(out, (0, 3, 1, 2))


if __name__ == "__main__":
    key = jax.random.PRNGKey(0)
    k_param, k_x = jax.random.split(key)

    batch, in_planes, planes, hw, stride = 2, 8, 4, 16, 1
    x = jax.random.normal(k_x, (batch, in_planes, hw, hw), jnp.float32)  # NCHW

    params = init_bottleneck_params(k_param, in_planes, planes, stride)
    y = bottleneck_forward(params, x, stride)
    y = jax.block_until_ready(y)

    expected = (batch, EXPANSION * planes, hw // stride, hw // stride)
    assert y.shape == expected, (y.shape, expected)
    assert bool(jnp.all(y >= 0.0)), "ReLU output must be non-negative"

    y_ref = _reference_forward(params, x, stride)
    err = float(jnp.max(jnp.abs(y - y_ref)))
    assert err < 0.1, f"max abs error vs reference: {err}"
    print("KERNEL_OK")
</pallas_src>

<mosaic_0001>
module attributes {stable_mosaic.version = 11 : i64} {
  func.func @_mm_fused_kernel(%arg0: i32, %arg1: memref<256x128xbf16, #tpu.memory_space<vmem>>, %arg2: memref<128x128xbf16, #tpu.memory_space<vmem>>, %arg3: memref<1x128xf32, #tpu.memory_space<vmem>>, %arg4: memref<256x128xbf16, #tpu.memory_space<vmem>>) attributes {dimension_semantics = [#tpu.dimension_semantics<parallel>], iteration_bounds = array<i64: 2>, scalar_prefetch = 0 : i64, scratch_operands = 0 : i64, tpu.core_type = #tpu.core_type<tc>, window_params = [{transform_indices = @transform_0, window_bounds = array<i64: 256, 128>}, {pipeline_mode = #tpu.pipeline_mode<synchronous>, transform_indices = @transform_1, window_bounds = array<i64: 128, 128>}, {pipeline_mode = #tpu.pipeline_mode<synchronous>, transform_indices = @transform_2, window_bounds = array<i64: 1, 128>}, {transform_indices = @transform_3, window_bounds = array<i64: 256, 128>}]} {
    %c0 = arith.constant 0 : index
    %c0_0 = arith.constant 0 : index
    %0 = vector.load %arg1[%c0, %c0_0] : memref<256x128xbf16, #tpu.memory_space<vmem>>, vector<256x128xbf16>
    %c0_1 = arith.constant 0 : index
    %c0_2 = arith.constant 0 : index
    %1 = vector.load %arg2[%c0_1, %c0_2] : memref<128x128xbf16, #tpu.memory_space<vmem>>, vector<128x128xbf16>
    %cst = arith.constant dense<0.000000e+00> : vector<256x128xf32>
    %2 = tpu.matmul %0, %1, %cst {dimension_numbers = #tpu.dot_dimension_numbers<[1], [0], [0], [1], [0, 0, 1, 1], [], []>} : vector<256x128xbf16>, vector<128x128xbf16>, vector<256x128xf32> -> vector<256x128xf32>
    %c0_3 = arith.constant 0 : index
    %c0_4 = arith.constant 0 : index
    %3 = vector.load %arg3[%c0_3, %c0_4] : memref<1x128xf32, #tpu.memory_space<vmem>>, vector<1x128xf32>
    %4 = vector.broadcast %3 : vector<1x128xf32> to vector<256x128xf32>
    %5 = arith.addf %2, %4 : vector<256x128xf32>
    %cst_5 = arith.constant 0.000000e+00 : f32
    %6 = vector.broadcast %cst_5 : f32 to vector<256x128xf32>
    %7 = arith.maximumf %5, %6 : vector<256x128xf32>
    %8 = arith.truncf %7 : vector<256x128xf32> to vector<256x128xbf16>
    %c0_6 = arith.constant 0 : index
    %c0_7 = arith.constant 0 : index
    %9 = vector.load %arg4[%c0_6, %c0_7] : memref<256x128xbf16, #tpu.memory_space<vmem>>, vector<256x128xbf16>
    tpu.vector_store %arg4[%c0_6, %c0_7], %8 {strides = array<i32>} : memref<256x128xbf16, #tpu.memory_space<vmem>>, vector<256x128xbf16>,
    return
  }
  func.func @transform_0(%arg0: i32) -> (i32, i32) {
    %c0_i32 = arith.constant 0 : i32
    %c0_i32_0 = arith.constant 0 : i32
    return %arg0, %c0_i32 : i32, i32
  }
  func.func @transform_1(%arg0: i32) -> (i32, i32) {
    %c0_i32 = arith.constant 0 : i32
    %c0_i32_0 = arith.constant 0 : i32
    %c0_i32_1 = arith.constant 0 : i32
    return %c0_i32, %c0_i32_0 : i32, i32
  }
  func.func @transform_2(%arg0: i32) -> (i32, i32) {
    %c0_i32 = arith.constant 0 : i32
    %c0_i32_0 = arith.constant 0 : i32
    %c0_i32_1 = arith.constant 0 : i32
    return %c0_i32, %c0_i32_0 : i32, i32
  }
  func.func @transform_3(%arg0: i32) -> (i32, i32) {
    %c0_i32 = arith.constant 0 : i32
    %c0_i32_0 = arith.constant 0 : i32
    return %arg0, %c0_i32 : i32, i32
  }
}

</mosaic_0001>

<bundles_post_ra>
// kernel: tpu_custom_call.1
= control target key start
LH: loop header
LB: loop body
LE: loop exit
PB: predicated region body
PF: predicated region fallthrough
CT: control target
= control target key end

     0   :  { %8 = vsyncpa [#allocation3], 0  ;;  %s1388_s0 = inlined_call_operand.hbm [shape: bf16[512,128], index: 0, kind: input, shape index: {}]   ;;  %s1389_s1 = inlined_call_operand.hbm [shape: bf16[128,128], index: 1, kind: input, shape index: {}]   ;;  %s1390_s2 = inlined_call_operand.vmem [shape: f32[1,128], index: 2, kind: input, shape index: {}]   ;;  %s1391_s3 = inlined_call_operand.hbm [shape: bf16[512,128], index: 3, kind: output, shape index: {}]  }
   0x1   :  { %10 = vsyncpa [#allocation3 + $0x1], 0 }
   0x2   :  { %11 = vsyncpa [#allocation6], 0 }
   0x3   :  { %12 = vsyncpa [#allocation4], 0 }
   0x4   :  { %14 = vsyncpa [#allocation4 + $0x1], 0  ;;  %s1166_s12 = smov 0   ;;  %s1168_s13 = smov 0  }
   0x5   :  { %s1170_s14 = smov 0   ;;  %s1172_s15 = smov 0  }
   0x6 LB: > { %s1187_s16 = sadd.s32 4294967295, %s1139_s15   ;;  %s690_s17 = sadd.s32 4294967294, %s1139_s15   ;;  %s1139_s15 = sphi %s1172_s15, %s1401_s15   ;;  %s1135_s14 = sphi %s1170_s14, %s1400_s14   ;;  %s1131_s13 = sphi %s1168_s13, %s1399_s13   ;;  %s1127_s12 = sphi %s1166_s12, %s1398_s12  }
   0x7   : > { %p40_p0 = scmp.ne.s32.totalorder %s1131_s13, %s1127_s12  ;;  %p41_p1 = scmp.eq.s32.totalorder %s1187_s16, 0 }
   0x8   : > { %p106_p2 = scmp.eq.s32.totalorder %s1187_s16, 1  ;;  %p112_p3 = scmp.eq.s32.totalorder %s690_s17, 1 }
   0x9   : > { %p1196_p4 = por %p41_p1, %p40_p0  ;;  %p691_p5 = scmp.ge.s32.totalorder %s1139_s15, 1 }
   0xa   : > { %p1201_p6 = por %p112_p3, %p40_p0  ;;  %p119_p7 = scmp.lt.s32.totalorder %s1139_s15, 3 }
   0xb   : > { %s130_s22 = sshll.u32 %s1389_s1, 4  ;;  %s1141_s24 = smov [#allocation5]   ;;  %s131_s22 = int_to_ptr.hbm [resolvable:$true] %s130_s22 }
   0xc   : > { %p1209_p8 = pnand %p691_p5, %p119_p7  ;;  %s132_s25 = sshll.u32 %s1141_s24, 4  ;;  %s133_s25 = int_to_ptr.vmem [resolvable:$true] %s132_s25 }
   0xd   : > { %s1219_s26 = sadd.s32 1, %s1139_s15   ;;  %s1142_s27 = smov 64  }
   0xe   : > { %p955_p9 = pneg %p1209_p8  ;;  %s1143_s28 = smov 4  }
   0xf   : > { %s24_s29 = ssub.s32 %s1139_s15, %s1219_s26  ;;  %s27_s30 = sadd.s32 1, %s1135_s14 }
  0x10   : > { %p956_p10 = pnand %p955_p9, %p41_p1  ;;  %p25_p12 = scmp.eq.s32.totalorder %s24_s29, 0 }
  0x11   : > { %p34_p13 = scmp.ne.s32.totalorder %s1135_s14, %s1131_s13  ;;  %p35_p0 = scmp.eq.s32.totalorder %s1139_s15, 0 }
  0x12   : > { %958 = dma.hbm_to_vmem [thread:$0]  (!%p956_p10), %s131_s22, 1024, %s133_s25, [#allocation6], %s1142_s27, %s1142_s27, %s1143_s28  }
  0x13   : > { %s1231_s4 = scalar_select %p25_p12, %s1135_s14, %s27_s30  }
  0x14   : > { %p1235_p3 = por %p106_p2, %p34_p13  ;;  %p968_p5 = scmp.lt.s32.totalorder %s1139_s15, 2 }
  0x15   : > { %s149_s6 = sand.u32 1, %s1135_s14   ;;  %s802_s7 = sshll.u32 %s1139_s15, 7 }
  0x16   : > { %p36_p7 = por %p35_p0, %p34_p13  ;;  %s694_s8 = sshll.u32 %s149_s6, 7 }
  0x17   : > { %s158_s11 = scalar_lea.hbm %s1388_s0, %s802_s7  ;;  %s153_s20 = scalar_lea.vmem [#allocation2], %s694_s8 }
  0x18   : > { %s159_s17 = sshll.u32 %s158_s11, 4  ;;  %s161_s21 = sshll.u32 %s153_s20, 4  ;;  %s160_s17 = int_to_ptr.hbm [resolvable:$true] %s159_s17  ;;  %s162_s21 = int_to_ptr.vmem [resolvable:$true] %s161_s21 }
  0x19   : > { %p1245_p9 = pnand %p968_p5, %p36_p7  ;;  %s150_s24 = scalar_lea.sflag [#allocation3], %s149_s6 }
  0x1a   : > { %s1039_s25 = sshra.s32 %s160_s17, 4  ;;  %s1046_s8 = scalar_lea.hbm %s1388_s0, 256  ;;  %s1040_s25 = int_to_ptr.hbm [resolvable:$true] %s1039_s25 }
  0x1b   : > { %s1041_s29 = scalar_lea.hbm %s1040_s25, 128  ;;  %p1043_p10 = pneg %p1245_p9 }
  0x1c   : > { %p1042_p2 = scmp.ne.s32.totalorder %s1040_s25, %s1041_s29  ;;  %p1047_p0 = scmp.lt.s32.totalorder %s1040_s25, %s1388_s0 }
  0x1d   : > { %p1048_p5 = scmp.lt.s32.totalorder %s1046_s8, %s1041_s29 }
  0x1e   : > { %p1044_p12 = pnand %p1043_p10, %p1042_p2 }
  0x1f   : > { %p1049_p7 = por %p1048_p5, %p1047_p0 }
  0x20   : > { %p1045_p13 = pneg %p1044_p12 }
  0x22   : > { %p1050_p11 = pnand %p1049_p7, %p1045_p13 }
  0x24   : > { %1053 = shalt.err (!%p1050_p11)
}
  0x25   : > { %962 = dma.hbm_to_vmem [thread:$0]  (!%p1245_p9), %s160_s17, 2048, %s162_s21, %s150_s24, %s1142_s27, %s1142_s27, %s1143_s28  }
  0x26   : > { %173 = sbr.rel (%p1209_p8) target bundleno = 278 (0x116), region = 32  ;;  %s1265_s6 = sand.u32 (!%p1209_p8), 1, %s1131_s13  }
  0x27   : > { %s698_s11 = sshll.u32 (!%p1209_p8), %s1265_s6, 7  ;;  %s176_s20 = scalar_lea.sflag (!%p1209_p8), [#allocation3], %s1265_s6 }
  0x28   : > { %s1271_s25 = scalar_lea.vmem (!%p1209_p8), [#allocation2], %s698_s11 }
  0x2b   : > { %1114 = dma.done.wait (%p1196_p4), %s176_s20, 2048  }
  0x2c   : > { %1116 = vsyncadd (%p1196_p4), %s176_s20, 4294965248 }
  0x2d   : > { %1118 = dma.done.wait (%p41_p1), [#allocation6], 1024  }
  0x2e   : > { %1120 = vsyncadd (%p41_p1), [#allocation6], 4294966272  ;;  %v826_v0 = vld [vmem:[#allocation5 + $0x38] sm:$0xff]  ;;  %v825_v1 = vld [vmem:[#allocation5 + $0x30] sm:$0xff]  ;;  %s1310_s27 = scalar_lea.vmem [#allocation7], %s698_s11  ;;  %s827_s28 = sshll.u32 %s1187_s16, 7 }
  0x2f   : > { %406 = vmatpush.bf16.msra.mxu0 %v826_v0  ;;  %923 = vmatpush.bf16.msra.mxu1 %v826_v0  ;;  %v824_v2 = vld [vmem:[#allocation5 + $0x28] sm:$0xff]  ;;  %v823_v3 = vld [vmem:[#allocation5 + $0x20] sm:$0xff]  ;;  %v822_v4 = vld [vmem:[#allocation5 + $0x18] sm:$0xff]  ;;  %s603_s22 = scalar_lea.hbm %s1391_s3, %s827_s28  ;;  %s604_s16 = sshll.u32 %s1310_s27, 4  ;;  %s605_s16 = int_to_ptr.vmem [resolvable:$true] %s604_s16 }
  0x30   : > { %924 = vmatpush.bf16.msra.mxu2 %v826_v0  ;;  %925 = vmatpush.bf16.msra.mxu3 %v826_v0  ;;  %v821_v5 = vld [vmem:[#allocation5 + $0x10] sm:$0xff]  ;;  %v820_v6 = vld [vmem:[#allocation5 + $0x8] sm:$0xff]  ;;  %v819_v7 = vld [vmem:[#allocation5] sm:$0xff]  ;;  %s606_s24 = sshll.u32 %s603_s22, 4  ;;  %s592_s29 = scalar_lea.sflag [#allocation4], %s1265_s6  ;;  %s607_s24 = int_to_ptr.hbm [resolvable:$true] %s606_s24 }
  0x31   : > { %v803_v8 = vld [vmem:[%s1271_s25] sm:$0xff]  ;;  %v804_v12 = vld [vmem:[%s1271_s25 + $0x8] sm:$0xff]  ;;  %v805_v16 = vld [vmem:[%s1271_s25 + $0x10] sm:$0xff]  ;;  %s1083_s30 = sshra.s32 %s607_s24, 4  ;;  %s1089_s10 = scalar_lea.hbm %s1391_s3, 256  ;;  %s1084_s30 = int_to_ptr.hbm [resolvable:$true] %s1083_s30 }
  0x32   : > { %v807_v9 = vld [vmem:[%s1271_s25 + $0x20] sm:$0xff]  ;;  %v808_v13 = vld [vmem:[%s1271_s25 + $0x28] sm:$0xff]  ;;  %v809_v17 = vld [vmem:[%s1271_s25 + $0x30] sm:$0xff]  ;;  %s1085_s7 = scalar_lea.hbm %s1084_s30, 128  ;;  %p1090_p11 = scmp.lt.s32.totalorder %s1084_s30, %s1391_s3 }
  0x33   : > { %407 = vmatpush.bf16.msra.mxu0 %v825_v1  ;;  %926 = vmatpush.bf16.msra.mxu1 %v825_v1  ;;  %v811_v10 = vld [vmem:[%s1271_s25 + $0x40] sm:$0xff]  ;;  %v812_v14 = vld [vmem:[%s1271_s25 + $0x48] sm:$0xff]  ;;  %v813_v18 = vld [vmem:[%s1271_s25 + $0x50] sm:$0xff]  ;;  %p1086_p1 = scmp.ne.s32.totalorder %s1084_s30, %s1085_s7  ;;  %p1091_p9 = scmp.lt.s32.totalorder %s1089_s10, %s1085_s7 }
  0x34   : > { %927 = vmatpush.bf16.msra.mxu2 %v825_v1  ;;  %928 = vmatpush.bf16.msra.mxu3 %v825_v1  ;;  %v815_v11 = vld [vmem:[%s1271_s25 + $0x60] sm:$0xff]  ;;  %v816_v15 = vld [vmem:[%s1271_s25 + $0x68] sm:$0xff]  ;;  %v817_v19 = vld [vmem:[%s1271_s25 + $0x70] sm:$0xff] }
  0x35   : > { %v806_v20 = vld [vmem:[%s1271_s25 + $0x18] sm:$0xff]  ;;  %v1300_v26 = vld [vmem:[%s1390_s2] ss:$0 sm:$0xff]  ;;  %p1087_p4 = pnand %p1086_p1, %p1235_p3  ;;  %p1092_p2 = por %p1091_p9, %p1090_p11 }
  0x36   : > { %v810_v21 = vld [vmem:[%s1271_s25 + $0x38] sm:$0xff] }
  0x37   : > { %408 = vmatpush.bf16.msra.mxu0 %v824_v2  ;;  %929 = vmatpush.bf16.msra.mxu1 %v824_v2  ;;  %v814_v22 = vld [vmem:[%s1271_s25 + $0x58] sm:$0xff]  ;;  %p1088_p8 = pneg %p1087_p4 }
  0x38   : > { %930 = vmatpush.bf16.msra.mxu2 %v824_v2  ;;  %931 = vmatpush.bf16.msra.mxu3 %v824_v2  ;;  %v818_v23 = vld [vmem:[%s1271_s25 + $0x78] sm:$0xff] }
  0x39   : > { %p1093_p10 = pnand %p1092_p2, %p1088_p8 }
  0x3b   : > { %409 = vmatpush.bf16.msra.mxu0 %v823_v3  ;;  %932 = vmatpush.bf16.msra.mxu1 %v823_v3 }
  0x3c   : > { %933 = vmatpush.bf16.msra.mxu2 %v823_v3  ;;  %934 = vmatpush.bf16.msra.mxu3 %v823_v3 }
  0x3f   : > { %410 = vmatpush.bf16.msra.mxu0 %v822_v4  ;;  %935 = vmatpush.bf16.msra.mxu1 %v822_v4 }
  0x40   : > { %936 = vmatpush.bf16.msra.mxu2 %v822_v4  ;;  %937 = vmatpush.bf16.msra.mxu3 %v822_v4 }
  0x43   : > { %411 = vmatpush.bf16.msra.mxu0 %v821_v5  ;;  %938 = vmatpush.bf16.msra.mxu1 %v821_v5 }
  0x44   : > { %939 = vmatpush.bf16.msra.mxu2 %v821_v5  ;;  %940 = vmatpush.bf16.msra.mxu3 %v821_v5 }
  0x47   : > { %412 = vmatpush.bf16.msra.mxu0 %v820_v6  ;;  %941 = vmatpush.bf16.msra.mxu1 %v820_v6 }
  0x48   : > { %942 = vmatpush.bf16.msra.mxu2 %v820_v6  ;;  %943 = vmatpush.bf16.msra.mxu3 %v820_v6 }
  0x4b   : > { %413 = vmatpush.bf16.msra.mxu0 %v819_v7  ;;  %944 = vmatpush.bf16.msra.mxu1 %v819_v7 }
  0x4c   : > { %945 = vmatpush.bf16.msra.mxu2 %v819_v7  ;;  %946 = vmatpush.bf16.msra.mxu3 %v819_v7 }
  0x4e   : > { %414 = vmatmul.bf16.vlgmr.msra.gmra.mxu0 %v803_v8  ;;  %434 = vmatmul.bf16.vlgmr.msra.gmra.mxu1 %v807_v9 }
  0x4f   : > { %454 = vmatmul.bf16.vlgmr.msra.gmra.mxu2 %v811_v10  ;;  %474 = vmatmul.bf16.vlgmr.msra.gmra.mxu3 %v815_v11 }
  0x5e   : > { %419 = vmatmul.bf16.gmra.mxu0 %v804_v12  ;;  %439 = vmatmul.bf16.gmra.mxu1 %v808_v13 }
  0x5f   : > { %459 = vmatmul.bf16.gmra.mxu2 %v812_v14  ;;  %479 = vmatmul.bf16.gmra.mxu3 %v816_v15 }
  0x6e   : > { %424 = vmatmul.bf16.gmra.mxu0 %v805_v16  ;;  %444 = vmatmul.bf16.gmra.mxu1 %v809_v17 }
  0x6f   : > { %464 = vmatmul.bf16.gmra.mxu2 %v813_v18  ;;  %484 = vmatmul.bf16.gmra.mxu3 %v817_v19 }
  0x7e   : > { %429 = vmatmul.bf16.gmra.mxu0 %v806_v20  ;;  %449 = vmatmul.bf16.gmra.mxu1 %v810_v21 }
  0x7f   : > { %469 = vmatmul.bf16.gmra.mxu2 %v814_v22  ;;  %489 = vmatmul.bf16.gmra.mxu3 %v818_v23 }
  0xcb   : > { %v415_v24 = vpop.f32.mrf.mxu0  ;;  %v435_v25 = vpop.f32.mrf.mxu1 }
  0xcc   : > { %v416_v27 = vadd.f32 %v1300_v26, %v415_v24  ;;  %v436_v28 = vadd.f32 %v1300_v26, %v435_v25 }
  0xce   : > { %v495_v35 = vmax.f32 %v416_v27, 0.0  ;;  %v503_v36 = vmax.f32 %v436_v28, 0.0 }
  0xd2   : > { %v455_v29 = vpop.f32.mrf.mxu2  ;;  %v475_v30 = vpop.f32.mrf.mxu3 }
  0xd3   : > { %v417_v31 = vpop.f32.mrf.mxu0  ;;  %v437_v32 = vpop.f32.mrf.mxu1  ;;  %v456_v41 = vadd.f32 %v1300_v26, %v455_v29  ;;  %v476_v42 = vadd.f32 %v1300_v26, %v475_v30 }
  0xd4   : > { %v418_v33 = vadd.f32 %v1300_v26, %v417_v31  ;;  %v438_v34 = vadd.f32 %v1300_v26, %v437_v32 }
  0xd5   : > { %v511_v49 = vmax.f32 %v456_v41, 0.0  ;;  %v519_v50 = vmax.f32 %v476_v42, 0.0 }
  0xd6   : > { %v496_v37 = vmax.f32 %v418_v33, 0.0  ;;  %v504_v38 = vmax.f32 %v438_v34, 0.0 }
  0xd8   : > { %v831_v39 = vpack.c.bf16 %v496_v37, %v495_v35  ;;  %v851_v40 = vpack.c.bf16 %v504_v38, %v503_v36 }
  0xda   : > { %832 = vst [vmem:[%s1310_s27] sm:$0xff] %v831_v39   ;;  %v457_v43 = vpop.f32.mrf.mxu2  ;;  %v477_v44 = vpop.f32.mrf.mxu3 }
  0xdb   : > { %911 = vst [vmem:[%s1310_s27 + $0x20] sm:$0xff] %v851_v40   ;;  %v458_v45 = vadd.f32 %v1300_v26, %v457_v43  ;;  %v478_v46 = vadd.f32 %v1300_v26, %v477_v44  ;;  %v420_v47 = vpop.f32.mrf.mxu0  ;;  %v440_v48 = vpop.f32.mrf.mxu1 }
  0xdc   : > { %v421_v55 = vadd.f32 %v1300_v26, %v420_v47  ;;  %v441_v56 = vadd.f32 %v1300_v26, %v440_v48 }
  0xdd   : > { %v512_v51 = vmax.f32 %v458_v45, 0.0  ;;  %v520_v52 = vmax.f32 %v478_v46, 0.0 }
  0xde   : > { %v497_v63 = vmax.f32 %v421_v55, 0.0  ;;  %v505_v0 = vmax.f32 %v441_v56, 0.0 }
  0xdf   : > { %v871_v53 = vpack.c.bf16 %v512_v51, %v511_v49  ;;  %v891_v54 = vpack.c.bf16 %v520_v52, %v519_v50 }
  0xe1   : > { %915 = vst [vmem:[%s1310_s27 + $0x40] sm:$0xff] %v871_v53  }
  0xe2   : > { %919 = vst [vmem:[%s1310_s27 + $0x60] sm:$0xff] %v891_v54   ;;  %v460_v57 = vpop.f32.mrf.mxu2  ;;  %v480_v58 = vpop.f32.mrf.mxu3 }
  0xe3   : > { %v422_v59 = vpop.f32.mrf.mxu0  ;;  %v442_v60 = vpop.f32.mrf.mxu1  ;;  %v461_v5 = vadd.f32 %v1300_v26, %v460_v57  ;;  %v481_v6 = vadd.f32 %v1300_v26, %v480_v58 }
  0xe4   : > { %v423_v61 = vadd.f32 %v1300_v26, %v422_v59  ;;  %v443_v62 = vadd.f32 %v1300_v26, %v442_v60 }
  0xe5   : > { %v513_v13 = vmax.f32 %v461_v5, 0.0  ;;  %v521_v14 = vmax.f32 %v481_v6, 0.0 }
  0xe6   : > { %v498_v1 = vmax.f32 %v423_v61, 0.0  ;;  %v506_v2 = vmax.f32 %v443_v62, 0.0 }
  0xe8   : > { %v836_v3 = vpack.c.bf16 %v498_v1, %v497_v63  ;;  %v856_v4 = vpack.c.bf16 %v506_v2, %v505_v0 }
  0xea   : > { %908 = vst [vmem:[%s1310_s27 + $0x8] sm:$0xff] %v836_v3   ;;  %v462_v7 = vpop.f32.mrf.mxu2  ;;  %v482_v8 = vpop.f32.mrf.mxu3 }
  0xeb   : > { %912 = vst [vmem:[%s1310_s27 + $0x28] sm:$0xff] %v856_v4   ;;  %v463_v9 = vadd.f32 %v1300_v26, %v462_v7  ;;  %v483_v10 = vadd.f32 %v1300_v26, %v482_v8  ;;  %v425_v11 = vpop.f32.mrf.mxu0  ;;  %v445_v12 = vpop.f32.mrf.mxu1 }
  0xec   : > { %v426_v19 = vadd.f32 %v1300_v26, %v425_v11  ;;  %v446_v20 = vadd.f32 %v1300_v26, %v445_v12 }
  0xed   : > { %v514_v15 = vmax.f32 %v463_v9, 0.0  ;;  %v522_v16 = vmax.f32 %v483_v10, 0.0 }
  0xee   : > { %v499_v28 = vmax.f32 %v426_v19, 0.0  ;;  %v507_v29 = vmax.f32 %v446_v20, 0.0 }
  0xef   : > { %v876_v17 = vpack.c.bf16 %v514_v15, %v513_v13  ;;  %v896_v18 = vpack.c.bf16 %v522_v16, %v521_v14 }
  0xf1   : > { %916 = vst [vmem:[%s1310_s27 + $0x48] sm:$0xff] %v876_v17  }
  0xf2   : > { %920 = vst [vmem:[%s1310_s27 + $0x68] sm:$0xff] %v896_v18   ;;  %v465_v21 = vpop.f32.mrf.mxu2  ;;  %v485_v22 = vpop.f32.mrf.mxu3 }
  0xf3   : > { %v427_v23 = vpop.f32.mrf.mxu0  ;;  %v447_v24 = vpop.f32.mrf.mxu1  ;;  %v466_v34 = vadd.f32 %v1300_v26, %v465_v21  ;;  %v486_v35 = vadd.f32 %v1300_v26, %v485_v22 }
  0xf4   : > { %v428_v25 = vadd.f32 %v1300_v26, %v427_v23  ;;  %v448_v27 = vadd.f32 %v1300_v26, %v447_v24 }
  0xf5   : > { %v515_v42 = vmax.f32 %v466_v34, 0.0  ;;  %v523_v43 = vmax.f32 %v486_v35, 0.0 }
  0xf6   : > { %v500_v30 = vmax.f32 %v428_v25, 0.0  ;;  %v508_v31 = vmax.f32 %v448_v27, 0.0 }
  0xf8   : > { %v841_v32 = vpack.c.bf16 %v500_v30, %v499_v28  ;;  %v861_v33 = vpack.c.bf16 %v508_v31, %v507_v29 }
  0xfa   : > { %909 = vst [vmem:[%s1310_s27 + $0x10] sm:$0xff] %v841_v32   ;;  %v467_v36 = vpop.f32.mrf.mxu2  ;;  %v487_v37 = vpop.f32.mrf.mxu3 }
  0xfb   : > { %913 = vst [vmem:[%s1310_s27 + $0x30] sm:$0xff] %v861_v33   ;;  %v468_v38 = vadd.f32 %v1300_v26, %v467_v36  ;;  %v488_v39 = vadd.f32 %v1300_v26, %v487_v37  ;;  %v430_v40 = vpop.f32.mrf.mxu0  ;;  %v450_v41 = vpop.f32.mrf.mxu1 }
  0xfc   : > { %v431_v48 = vadd.f32 %v1300_v26, %v430_v40  ;;  %v451_v49 = vadd.f32 %v1300_v26, %v450_v41 }
  0xfd   : > { %v516_v44 = vmax.f32 %v468_v38, 0.0  ;;  %v524_v45 = vmax.f32 %v488_v39, 0.0 }
  0xfe   : > { %v501_v56 = vmax.f32 %v431_v48, 0.0  ;;  %v509_v57 = vmax.f32 %v451_v49, 0.0 }
  0xff   : > { %v881_v46 = vpack.c.bf16 %v516_v44, %v515_v42  ;;  %v901_v47 = vpack.c.bf16 %v524_v45, %v523_v43 }
 0x101   : > { %917 = vst [vmem:[%s1310_s27 + $0x50] sm:$0xff] %v881_v46  }
 0x102   : > { %921 = vst [vmem:[%s1310_s27 + $0x70] sm:$0xff] %v901_v47   ;;  %v470_v50 = vpop.f32.mrf.mxu2  ;;  %v490_v51 = vpop.f32.mrf.mxu3 }
 0x103   : > { %v432_v52 = vpop.f32.mrf.mxu0  ;;  %v452_v53 = vpop.f32.mrf.mxu1  ;;  %v471_v62 = vadd.f32 %v1300_v26, %v470_v50  ;;  %v491_v63 = vadd.f32 %v1300_v26, %v490_v51 }
 0x104   : > { %v433_v54 = vadd.f32 %v1300_v26, %v432_v52  ;;  %v453_v55 = vadd.f32 %v1300_v26, %v452_v53 }
 0x105   : > { %v517_v4 = vmax.f32 %v471_v62, 0.0  ;;  %v525_v5 = vmax.f32 %v491_v63, 0.0 }
 0x106   : > { %v502_v58 = vmax.f32 %v433_v54, 0.0  ;;  %v510_v59 = vmax.f32 %v453_v55, 0.0 }
 0x108   : > { %v846_v60 = vpack.c.bf16 %v502_v58, %v501_v56  ;;  %v866_v61 = vpack.c.bf16 %v510_v59, %v509_v57 }
 0x10a   : > { %910 = vst [vmem:[%s1310_s27 + $0x18] sm:$0xff] %v846_v60   ;;  %v472_v0 = vpop.f32.mrf.mxu2  ;;  %v492_v1 = vpop.f32.mrf.mxu3 }
 0x10b   : > { %914 = vst [vmem:[%s1310_s27 + $0x38] sm:$0xff] %v866_v61   ;;  %v473_v2 = vadd.f32 %v1300_v26, %v472_v0  ;;  %v493_v3 = vadd.f32 %v1300_v26, %v492_v1 }
 0x10d   : > { %v518_v6 = vmax.f32 %v473_v2, 0.0  ;;  %v526_v7 = vmax.f32 %v493_v3, 0.0 }
 0x10f   : > { %v886_v8 = vpack.c.bf16 %v518_v6, %v517_v4  ;;  %v906_v9 = vpack.c.bf16 %v526_v7, %v525_v5 }
 0x111   : > { %918 = vst [vmem:[%s1310_s27 + $0x58] sm:$0xff] %v886_v8  }
 0x112   : > { %922 = vst [vmem:[%s1310_s27 + $0x78] sm:$0xff] %v906_v9  }
 0x113   : > { %1096 = shalt.err (!%p1093_p10)
}
 0x114   : > { %s1144_s6 = smov 64   ;;  %s1145_s25 = smov 4  }
 0x115   : > { %953 = dma.vmem_to_hbm [thread:$0]  (%p1235_p3), %s605_s16, 2048, %s607_s24, %s592_s29, %s1144_s6, %s1144_s6, %s1145_s25  }
 0x116 PF: > { %s621_s18 = sand.u32 1, %s1127_s12   ;;  %p1397_p12 = scmp.ge.s32.totalorder %s1139_s15, 2 }
 0x117   : > { %s622_s23 = scalar_lea.sflag [#allocation4], %s621_s18 }
 0x118   : > { %p964_p13 = pnand %p1397_p12, %p1201_p6 }
 0x11a   : > { %p965_p0 = pneg %p964_p13 }
 0x11c   : > { %1122 = dma.done.wait (%p965_p0), %s622_s23, 2048  }
 0x11d   : > { %1124 = vsyncadd (%p965_p0), %s622_s23, 4294965248  ;;  %p17_p5 = scmp.ge.s32.totalorder %s1219_s26, 4   ;;  %s1398_s12 = smov %s1131_s13 }
 0x11e   : > { %s1399_s13 = smov %s1135_s14  ;;  %s1400_s14 = smov %s1231_s4 }
 0x11f   : > { %s1401_s15 = smov %s1219_s26  ;;  %19 = sbr.rel (!%p17_p5) target bundleno = 6 (0x6), region = 81 }
 0x124   :  { %628 = vsyncpa [#allocation3], 1 }
 0x125   :  { %630 = vsyncpa [#allocation3 + $0x1], 1 }
 0x126   :  { %631 = vsyncpa [#allocation6], 1 }
 0x127   :  { %632 = vsyncpa [#allocation4], 1 }
 0x128   :  { %634 = vsyncpa [#allocation4 + $0x1], 1 }

</bundles_post_ra>
